<compile_context>
chip_gen: v7x
topology: tpu7x:2x2x1
jax: 0.10.0
libtpu: 0.0.40
codegen_flags: <defaults>
</compile_context>

<pallas_src>
import jax
import jax.numpy as jnp
from jax.experimental import pallas as pl
from jax.experimental.pallas import tpu as pltpu

IN_DIM = 28 * 28   # 784
H1 = 128
H2 = 64
OUT = 10
TB_MAX = 2048      # batch tile rows (multiple of 128)
SMALL_B = 256      # below this, a single full-batch tile (no 128-multiple needed)


def _round_up(n, m):
    return ((n + m - 1) // m) * m


def mlp_kernel(x_ref, w1_ref, b1_ref, w2_ref, b2_ref, w3t_ref, b3_ref, o_ref):
    """relu(x@W1+b1) -> relu(@W2+b2) -> transposed (OUT, tb) logits for one tile."""
    # x arrives f32 straight from HBM; cast to bf16 in-kernel instead of
    # materializing a bf16 copy of x in HBM (halves total x traffic).
    x = x_ref[...].astype(jnp.bfloat16)                                # (tb, 784)
    h1 = jnp.dot(x, w1_ref[...], preferred_element_type=jnp.float32) + b1_ref[...]
    h1 = jnp.maximum(h1, 0.0)                                          # (tb, 128) f32
    h2 = jnp.dot(h1.astype(jnp.bfloat16), w2_ref[...],
                 preferred_element_type=jnp.float32) + b2_ref[...]
    h2 = jnp.maximum(h2, 0.0)                                          # (tb, 64) f32
    # Last layer emitted transposed: (OUT, tb) = contract W3^T (OUT, 64) with
    # h2 (tb, 64) over the hidden dim.  Lane-dense (tb multiple of 128 or full
    # dim) store of only the real logit bytes.
    logits_t = jax.lax.dot_general(
        w3t_ref[...], h2.astype(jnp.bfloat16),
        dimension_numbers=(((1,), (1,)), ((), ())),
        preferred_element_type=jnp.float32)                            # (OUT, tb)
    o_ref[...] = logits_t + b3_ref[...]                                # + (OUT, 1)


def simple_nn_forward(x, params):
    """x: (B, 1, 28, 28) or (B, 784) float32. Returns (B, 10) f32 logits.

    Note: matmul operands are intentionally bf16 (f32 accumulation) — logits
    differ from a pure-f32 torch forward at ~1e-2 level, fine for class scores.
    """
    w1, b1, w2, b2, w3, b3 = params
    x2d = x.reshape(-1, IN_DIM).astype(jnp.float32)    # torch: x.view(-1, 28*28)
    B = x2d.shape[0]

    # Batch tiling: no HBM-side pad/cast copies of x.
    #   * B < SMALL_B : one full-batch tile (block dims == array dims).
    #   * otherwise   : >= 2 tiles (v7x megacore), tb multiple of 128 so the
    #     transposed-output stores stay lane-dense; the ragged last block is
    #     masked by Pallas (garbage OOB rows only ever feed OOB output columns).
    if B < SMALL_B:
        tb = B
    else:
        tb = min(TB_MAX, _round_up(pl.cdiv(B, 2), 128))
    grid = (pl.cdiv(B, tb),)

    # bf16 weights (f32 accumulation in-kernel); kept VMEM-resident across
    # batch tiles via constant index_maps.
    w1_bf = w1.astype(jnp.bfloat16)
    w2_bf = w2.astype(jnp.bfloat16)
    w3t_bf = w3.T.astype(jnp.bfloat16)        # (OUT, H2)
    b3_t = b3.reshape(OUT, 1)                 # broadcast over the lane (batch) dim

    const = lambda i: (0, 0)

    out_t = pl.pallas_call(
        mlp_kernel,
        out_shape=jax.ShapeDtypeStruct((OUT, B), jnp.float32),
        grid_spec=pltpu.PrefetchScalarGridSpec(
            num_scalar_prefetch=0,
            grid=grid,
            in_specs=[
                pl.BlockSpec((tb, IN_DIM), lambda i: (i, 0)),   # x tile (f32)
                pl.BlockSpec((IN_DIM, H1), const),              # W1
                pl.BlockSpec((1, H1), const),                   # b1
                pl.BlockSpec((H1, H2), const),                  # W2
                pl.BlockSpec((1, H2), const),                   # b2
                pl.BlockSpec((OUT, H2), const),                 # W3^T
                pl.BlockSpec((OUT, 1), const),                  # b3 (column)
            ],
            out_specs=pl.BlockSpec((OUT, tb), lambda i: (0, i)),
        ),
        compiler_params=pltpu.CompilerParams(
            dimension_semantics=("parallel",),     # shard batch tiles across v7x TCs
            vmem_limit_bytes=32 * 1024 * 1024,     # tb=2048 f32-x double-buffer on v5e
        ),
    )(x2d, w1_bf, b1, w2_bf, b2, w3t_bf, b3_t)

    return out_t.T                                 # (B, 10) f32 logits


def init_params(key):
    """Deterministic init mimicking torch.nn.Linear default (U[-1/sqrt(fan_in), +])."""
    def linear(key, fan_in, fan_out):
        kw, kb = jax.random.split(key)
        bound = 1.0 / jnp.sqrt(jnp.float32(fan_in))
        # stored as (in, out) so the forward computes x @ W
        w = jax.random.uniform(kw, (fan_in, fan_out), jnp.float32, -bound, bound)
        b = jax.random.uniform(kb, (1, fan_out), jnp.float32, -bound, bound)
        return w, b

    k1, k2, k3 = jax.random.split(key, 3)
    w1, b1 = linear(k1, IN_DIM, H1)
    w2, b2 = linear(k2, H1, H2)
    w3, b3 = linear(k3, H2, OUT)
    return (w1, b1, w2, b2, w3, b3)


def _ref_forward_bf16(x2d, params):
    """Plain-JAX reference with the same bf16-operand / f32-accum recipe."""
    w1, b1, w2, b2, w3, b3 = params
    h = jnp.dot(x2d.astype(jnp.bfloat16), w1.astype(jnp.bfloat16),
                preferred_element_type=jnp.float32) + b1
    h = jnp.maximum(h, 0.0)
    h = jnp.dot(h.astype(jnp.bfloat16), w2.astype(jnp.bfloat16),
                preferred_element_type=jnp.float32) + b2
    h = jnp.maximum(h, 0.0)
    return jnp.dot(h.astype(jnp.bfloat16), w3.astype(jnp.bfloat16),
                   preferred_element_type=jnp.float32) + b3


if __name__ == "__main__":
    key = jax.random.PRNGKey(0)
    k_params, k_x, k_x2 = jax.random.split(key, 3)

    params = init_params(k_params)
    # small MNIST-like batch: (B, 1, 28, 28) NCHW
    x = jax.random.normal(k_x, (2, 1, 28, 28), jnp.float32)

    logits = simple_nn_forward(x, params)
    jax.block_until_ready(logits)
    assert logits.shape == (2, OUT)

    xf = x.reshape(-1, IN_DIM)

    # Exact-recipe reference (bf16 operands, f32 accumulation).
    ref_bf16 = _ref_forward_bf16(xf, params)
    assert jnp.allclose(logits, ref_bf16, atol=1e-3, rtol=1e-3)

    # Full-f32 semantic sanity check (looser tolerance due to bf16 operands).
    w1, b1, w2, b2, w3, b3 = params
    ref = jnp.maximum(xf @ w1 + b1, 0.0)
    ref = jnp.maximum(ref @ w2 + b2, 0.0)
    ref = ref @ w3 + b3
    assert jnp.allclose(logits, ref, atol=5e-2, rtol=5e-2)

    # Exercise the multi-tile + ragged-last-block path (B=300 -> tb=256, grid=(2,)).
    xl = jax.random.normal(k_x2, (300, 1, 28, 28), jnp.float32)
    logits_l = simple_nn_forward(xl, params)
    jax.block_until_ready(logits_l)
    assert logits_l.shape == (300, OUT)
    ref_l = _ref_forward_bf16(xl.reshape(-1, IN_DIM), params)
    assert jnp.allclose(logits_l, ref_l, atol=1e-3, rtol=1e-3)

    print("KERNEL_OK")
</pallas_src>

<mosaic_0001>
module attributes {stable_mosaic.version = 11 : i64} {
  func.func @mlp_kernel(%arg0: i32, %arg1: memref<2x784xf32, #tpu.memory_space<vmem>>, %arg2: memref<784x128xbf16, #tpu.memory_space<vmem>>, %arg3: memref<1x128xf32, #tpu.memory_space<vmem>>, %arg4: memref<128x64xbf16, #tpu.memory_space<vmem>>, %arg5: memref<1x64xf32, #tpu.memory_space<vmem>>, %arg6: memref<10x64xbf16, #tpu.memory_space<vmem>>, %arg7: memref<10x1xf32, #tpu.memory_space<vmem>>, %arg8: memref<10x2xf32, #tpu.memory_space<vmem>>) attributes {dimension_semantics = [#tpu.dimension_semantics<parallel>], iteration_bounds = array<i64: 1>, scalar_prefetch = 0 : i64, scratch_operands = 0 : i64, tpu.core_type = #tpu.core_type<tc>, window_params = [{transform_indices = @transform_0, window_bounds = array<i64: 2, 784>}, {pipeline_mode = #tpu.pipeline_mode<synchronous>, transform_indices = @transform_1, window_bounds = array<i64: 784, 128>}, {pipeline_mode = #tpu.pipeline_mode<synchronous>, transform_indices = @transform_2, window_bounds = array<i64: 1, 128>}, {pipeline_mode = #tpu.pipeline_mode<synchronous>, transform_indices = @transform_3, window_bounds = array<i64: 128, 64>}, {pipeline_mode = #tpu.pipeline_mode<synchronous>, transform_indices = @transform_4, window_bounds = array<i64: 1, 64>}, {pipeline_mode = #tpu.pipeline_mode<synchronous>, transform_indices = @transform_5, window_bounds = array<i64: 10, 64>}, {pipeline_mode = #tpu.pipeline_mode<synchronous>, transform_indices = @transform_6, window_bounds = array<i64: 10, 1>}, {transform_indices = @transform_7, window_bounds = array<i64: 10, 2>}]} {
    %c0 = arith.constant 0 : index
    %c0_0 = arith.constant 0 : index
    %0 = vector.load %arg1[%c0, %c0_0] : memref<2x784xf32, #tpu.memory_space<vmem>>, vector<2x784xf32>
    %1 = arith.truncf %0 : vector<2x784xf32> to vector<2x784xbf16>
    %c0_1 = arith.constant 0 : index
    %c0_2 = arith.constant 0 : index
    %2 = vector.load %arg2[%c0_1, %c0_2] : memref<784x128xbf16, #tpu.memory_space<vmem>>, vector<784x128xbf16>
    %cst = arith.constant dense<0.000000e+00> : vector<2x128xf32>
    %3 = tpu.matmul %1, %2, %cst {dimension_numbers = #tpu.dot_dimension_numbers<[1], [0], [0], [1], [0, 0, 1, 1], [], []>} : vector<2x784xbf16>, vector<784x128xbf16>, vector<2x128xf32> -> vector<2x128xf32>
    %c0_3 = arith.constant 0 : index
    %c0_4 = arith.constant 0 : index
    %4 = vector.load %arg3[%c0_3, %c0_4] : memref<1x128xf32, #tpu.memory_space<vmem>>, vector<1x128xf32>
    %5 = vector.broadcast %4 : vector<1x128xf32> to vector<2x128xf32>
    %6 = arith.addf %3, %5 : vector<2x128xf32>
    %cst_5 = arith.constant 0.000000e+00 : f32
    %7 = vector.broadcast %cst_5 : f32 to vector<2x128xf32>
    %8 = arith.maximumf %6, %7 : vector<2x128xf32>
    %9 = arith.truncf %8 : vector<2x128xf32> to vector<2x128xbf16>
    %c0_6 = arith.constant 0 : index
    %c0_7 = arith.constant 0 : index
    %10 = vector.load %arg4[%c0_6, %c0_7] : memref<128x64xbf16, #tpu.memory_space<vmem>>, vector<128x64xbf16>
    %cst_8 = arith.constant dense<0.000000e+00> : vector<2x64xf32>
    %11 = tpu.matmul %9, %10, %cst_8 {dimension_numbers = #tpu.dot_dimension_numbers<[1], [0], [0], [1], [0, 0, 1, 1], [], []>} : vector<2x128xbf16>, vector<128x64xbf16>, vector<2x64xf32> -> vector<2x64xf32>
    %c0_9 = arith.constant 0 : index
    %c0_10 = arith.constant 0 : index
    %12 = vector.load %arg5[%c0_9, %c0_10] : memref<1x64xf32, #tpu.memory_space<vmem>>, vector<1x64xf32>
    %13 = vector.broadcast %12 : vector<1x64xf32> to vector<2x64xf32>
    %14 = arith.addf %11, %13 : vector<2x64xf32>
    %cst_11 = arith.constant 0.000000e+00 : f32
    %15 = vector.broadcast %cst_11 : f32 to vector<2x64xf32>
    %16 = arith.maximumf %14, %15 : vector<2x64xf32>
    %c0_12 = arith.constant 0 : index
    %c0_13 = arith.constant 0 : index
    %17 = vector.load %arg6[%c0_12, %c0_13] : memref<10x64xbf16, #tpu.memory_space<vmem>>, vector<10x64xbf16>
    %18 = arith.truncf %16 : vector<2x64xf32> to vector<2x64xbf16>
    %cst_14 = arith.constant dense<0.000000e+00> : vector<10x2xf32>
    %19 = tpu.matmul %17, %18, %cst_14 {dimension_numbers = #tpu.dot_dimension_numbers<[1], [1], [0], [0], [0, 0, 1, 0], [], []>} : vector<10x64xbf16>, vector<2x64xbf16>, vector<10x2xf32> -> vector<10x2xf32>
    %c0_15 = arith.constant 0 : index
    %c0_16 = arith.constant 0 : index
    %20 = vector.load %arg7[%c0_15, %c0_16] : memref<10x1xf32, #tpu.memory_space<vmem>>, vector<10x1xf32>
    %21 = vector.broadcast %20 : vector<10x1xf32> to vector<10x2xf32>
    %22 = arith.addf %19, %21 : vector<10x2xf32>
    %c0_17 = arith.constant 0 : index
    %c0_18 = arith.constant 0 : index
    %23 = vector.load %arg8[%c0_17, %c0_18] : memref<10x2xf32, #tpu.memory_space<vmem>>, vector<10x2xf32>
    tpu.vector_store %arg8[%c0_17, %c0_18], %22 {strides = array<i32>} : memref<10x2xf32, #tpu.memory_space<vmem>>, vector<10x2xf32>,
    return
  }
  func.func @transform_0(%arg0: i32) -> (i32, i32) {
    %c0_i32 = arith.constant 0 : i32
    %c0_i32_0 = arith.constant 0 : i32
    return %arg0, %c0_i32 : i32, i32
  }
  func.func @transform_1(%arg0: i32) -> (i32, i32) {
    %c0_i32 = arith.constant 0 : i32
    %c0_i32_0 = arith.constant 0 : i32
    %c0_i32_1 = arith.constant 0 : i32
    return %c0_i32, %c0_i32_0 : i32, i32
  }
  func.func @transform_2(%arg0: i32) -> (i32, i32) {
    %c0_i32 = arith.constant 0 : i32
    %c0_i32_0 = arith.constant 0 : i32
    %c0_i32_1 = arith.constant 0 : i32
    return %c0_i32, %c0_i32_0 : i32, i32
  }
  func.func @transform_3(%arg0: i32) -> (i32, i32) {
    %c0_i32 = arith.constant 0 : i32
    %c0_i32_0 = arith.constant 0 : i32
    %c0_i32_1 = arith.constant 0 : i32
    return %c0_i32, %c0_i32_0 : i32, i32
  }
  func.func @transform_4(%arg0: i32) -> (i32, i32) {
    %c0_i32 = arith.constant 0 : i32
    %c0_i32_0 = arith.constant 0 : i32
    %c0_i32_1 = arith.constant 0 : i32
    return %c0_i32, %c0_i32_0 : i32, i32
  }
  func.func @transform_5(%arg0: i32) -> (i32, i32) {
    %c0_i32 = arith.constant 0 : i32
    %c0_i32_0 = arith.constant 0 : i32
    %c0_i32_1 = arith.constant 0 : i32
    return %c0_i32, %c0_i32_0 : i32, i32
  }
  func.func @transform_6(%arg0: i32) -> (i32, i32) {
    %c0_i32 = arith.constant 0 : i32
    %c0_i32_0 = arith.constant 0 : i32
    %c0_i32_1 = arith.constant 0 : i32
    return %c0_i32, %c0_i32_0 : i32, i32
  }
  func.func @transform_7(%arg0: i32) -> (i32, i32) {
    %c0_i32 = arith.constant 0 : i32
    %c0_i32_0 = arith.constant 0 : i32
    return %c0_i32, %arg0 : i32, i32
  }
}

</mosaic_0001>

<bundles_post_ra>
// kernel: tpu_custom_call.1
= control target key start
LH: loop header
LB: loop body
LE: loop exit
PB: predicated region body
PF: predicated region fallthrough
CT: control target
= control target key end

     0   :  { %12 = vsyncpa [#allocation3], 0  ;;  %s1111_s24 = smov [#allocation2]   ;;  %s1238_s0 = inlined_call_operand.vmem [shape: f32[2,784], index: 0, kind: input, shape index: {}]   ;;  %s1239_s1 = inlined_call_operand.hbm [shape: bf16[784,128], index: 1, kind: input, shape index: {}]   ;;  %s1240_s2 = inlined_call_operand.vmem [shape: f32[1,128], index: 2, kind: input, shape index: {}]   ;;  %s1241_s3 = inlined_call_operand.vmem [shape: bf16[128,64], index: 3, kind: input, shape index: {}]   ;;  %s1242_s4 = inlined_call_operand.vmem [shape: f32[1,64], index: 4, kind: input, shape index: {}]   ;;  %s1243_s5 = inlined_call_operand.vmem [shape: bf16[10,64], index: 5, kind: input, shape index: {}]   ;;  %s1244_s6 = inlined_call_operand.vmem [shape: f32[10,1], index: 6, kind: input, shape index: {}]   ;;  %s1245_s7 = inlined_call_operand.vmem [shape: f32[10,2], index: 7, kind: output, shape index: {}]  }
   0x1   :  { %s20_s25 = sshll.u32 %s1111_s24, 4  ;;  %s1087_s28 = scalar_lea.hbm %s1239_s1, 6272  ;;  %s21_s25 = int_to_ptr.vmem [resolvable:$true] %s20_s25 }
   0x2   :  { %p1088_p0 = scmp.ne.s32.totalorder %s1239_s1, %s1087_s28  ;;  %p1091_p1 = scmp.lt.u32.totalorder %s1087_s28, %s1239_s1 }
   0x4   :  { %p1093_p2 = pnand %p1091_p1, %p1088_p0 }
   0x6   :  { %1096 = shalt.err (!%p1093_p2)
}
   0x7   :  { %s1097_s10 = scalar_lea.vmem %s21_s25, 6272  ;;  %p1102_p4 = scmp.lt.s32.totalorder %s21_s25, %s21_s25 }
   0x8   :  { %p1098_p3 = scmp.ne.s32.totalorder %s21_s25, %s1097_s10  ;;  %p1103_p5 = scmp.lt.s32.totalorder %s1097_s10, %s1097_s10 }
   0xa   :  { %p1104_p6 = por %p1103_p5, %p1102_p4 }
   0xc   :  { %p1105_p7 = pnand %p1104_p6, %p1098_p3 }
   0xe   :  { %1108 = shalt.err (!%p1105_p7)
}
   0xf   :  { %s1112_s11 = smov 64   ;;  %s1113_s12 = smov 4  }
  0x10   :  { %26 = dma.hbm_to_vmem [thread:$0]  %s1239_s1, 6272, %s21_s25, [#allocation3], %s1112_s11, %s1112_s11, %s1113_s12  }
  0x11   :  { %1109 = dma.done.wait [#allocation3], 6272  }
  0x12   :  { %1110 = vsyncadd [#allocation3], 4294961024  ;;  %v1027_v0 = vld [vmem:[#allocation2 + $0x40] sm:$0xff]   ;;  %v1031_v4 = vld [vmem:[#allocation2 + $0x48] sm:$0xff]   ;;  %v1114_v21 = vmov 1983009808   ;;  %v49_v23 = vlaneseq }
  0x13   :  { %v1028_v1 = vld [vmem:[#allocation2] sm:$0xff]   ;;  %908 = vmatprep.subr.bf16.mxu0 %v1027_v0  ;;  %v1032_v5 = vld [vmem:[#allocation2 + $0x8] sm:$0xff]   ;;  %v1035_v8 = vld [vmem:[#allocation2 + $0x50] sm:$0xff]   ;;  %v47_v22 = vunpack.c.l.s4 %v1114_v21  ;;  %v1115_v45 = vmov 0.0   ;;  %vm1116_vm0 = vmmov 0   ;;  %vm491_vm1 = vcmask 130048  }
  0x14   :  { %v1029_v2 = vld [vmem:[#allocation2 + $0xc0] sm:$0xff]   ;;  %909 = vmatpush3.bf16.msra.mxu0 %v1028_v1  ;;  %v1033_v6 = vld [vmem:[#allocation2 + $0xc8] sm:$0xff]   ;;  %v1036_v9 = vld [vmem:[#allocation2 + $0x10] sm:$0xff]   ;;  %v50_v29 = vshrl.u32 %v49_v23, 7  ;;  %vm789_vm2 = vcmask 523264   ;;  %vm837_vm3 = vcmask 15360  }
  0x15   :  { %v1030_v3 = vld [vmem:[#allocation2 + $0x80] sm:$0xff]   ;;  %930 = vmatprep.subr.bf16.mxu1 %v1029_v2  ;;  %910 = vmatprep.subr.bf16.mxu0 %v1031_v4  ;;  %v1034_v7 = vld [vmem:[#allocation2 + $0x88] sm:$0xff]   ;;  %v1037_v10 = vld [vmem:[#allocation2 + $0xd0] sm:$0xff]   ;;  %v48_v28 = vunpack.c.0.s8 %v47_v22  ;;  %vm839_vm4 = vcmask 9216  }
  0x16   :  { %931 = vmatpush3.bf16.msra.mxu1 %v1030_v3  ;;  %v1038_v11 = vld [vmem:[#allocation2 + $0x90] sm:$0xff]   ;;  %v1039_v12 = vld [vmem:[#allocation2 + $0x58] sm:$0xff]   ;;  %v1043_v16 = vld [vmem:[#allocation2 + $0x60] sm:$0xff]  }
  0x17   :  { %932 = vmatprep.subr.bf16.mxu1 %v1033_v6  ;;  %v1040_v13 = vld [vmem:[#allocation2 + $0x18] sm:$0xff]   ;;  %v1044_v17 = vld [vmem:[#allocation2 + $0x20] sm:$0xff]   ;;  %v1047_v20 = vld [vmem:[#allocation2 + $0x68] sm:$0xff]   ;;  %v51_v34 = vsub.s32 %v48_v28, %v50_v29 }
  0x18   :  { %911 = vmatpush3.bf16.msra.mxu0 %v1032_v5  ;;  %v1041_v14 = vld [vmem:[#allocation2 + $0xd8] sm:$0xff]   ;;  %v1045_v18 = vld [vmem:[#allocation2 + $0xe0] sm:$0xff]   ;;  %v1048_v24 = vld [vmem:[#allocation2 + $0x28] sm:$0xff]  }
  0x19   :  { %912 = vmatprep.subr.bf16.mxu0 %v1035_v8  ;;  %v1042_v15 = vld [vmem:[#allocation2 + $0x98] sm:$0xff]   ;;  %v1046_v19 = vld [vmem:[#allocation2 + $0xa0] sm:$0xff]   ;;  %v1049_v25 = vld [vmem:[#allocation2 + $0xe8] sm:$0xff]  }
  0x1a   :  { %933 = vmatpush3.bf16.msra.mxu1 %v1034_v7  ;;  %v1050_v26 = vld [vmem:[#allocation2 + $0xa8] sm:$0xff]   ;;  %v1051_v27 = vld [vmem:[#allocation2 + $0x70] sm:$0xff]   ;;  %v1055_v33 = vld [vmem:[#allocation2 + $0x78] sm:$0xff]  }
  0x1b   :  { %934 = vmatprep.subr.bf16.mxu1 %v1037_v10  ;;  %v1052_v30 = vld [vmem:[#allocation2 + $0x30] sm:$0xff]   ;;  %v1056_v35 = vld [vmem:[#allocation2 + $0x38] sm:$0xff]   ;;  %v41_v37 = vld [vmem:[%s1238_s0] sm:$0xff] }
  0x1c   :  { %913 = vmatpush3.bf16.msra.mxu0 %v1036_v9  ;;  %v1053_v31 = vld [vmem:[#allocation2 + $0xf0] sm:$0xff]   ;;  %v1057_v36 = vld [vmem:[#allocation2 + $0xf8] sm:$0xff]   ;;  %v52_v38 = vrot.slane %v41_v37, %v51_v34  ;;  %v45_v40 = vcombine.high %v41_v37, %v41_v37  ;;  %v1059_v41 = vld [vmem:[#allocation2 + $0x140] sm:$0xff]  }
  0x1d   :  { %914 = vmatprep.subr.bf16.mxu0 %v1039_v12  ;;  %v1054_v32 = vld [vmem:[#allocation2 + $0xb0] sm:$0xff]   ;;  %v1058_v39 = vld [vmem:[#allocation2 + $0xb8] sm:$0xff]   ;;  %v1061_v48 = vld [vmem:[#allocation2 + $0x100] sm:$0xff]  }
  0x1e   :  { %935 = vmatpush3.bf16.msra.mxu1 %v1038_v11  ;;  %v60_v42 = vcombine.high %v52_v38, %v52_v38  ;;  %v59_v43 = vrot.slane %v45_v40, %v51_v34  ;;  %v85_v44 = vpack.c.bf16 %v52_v38, %v52_v38  ;;  %v1062_v50 = vld [vmem:[#allocation2 + $0x148] sm:$0xff]   ;;  %v1064_v53 = vld [vmem:[#allocation2 + $0x150] sm:$0xff]   ;;  %v1066_v55 = vld [vmem:[#allocation2 + $0x158] sm:$0xff]  }
  0x1f   :  { %936 = vmatprep.subr.bf16.mxu1 %v1041_v14  ;;  %v1063_v52 = vld [vmem:[#allocation2 + $0x108] sm:$0xff]   ;;  %v1065_v54 = vld [vmem:[#allocation2 + $0x110] sm:$0xff]   ;;  %v1067_v56 = vld [vmem:[#allocation2 + $0x118] sm:$0xff]  }
  0x20   :  { %915 = vmatpush3.bf16.msra.mxu0 %v1040_v13  ;;  %v86_v46 = vpack.c.bf16 %v60_v42, %v60_v42  ;;  %v61_v47 = vcombine.high %v59_v43, %v59_v43  ;;  %v87_v49 = vpack.c.bf16 %v59_v43, %v59_v43  ;;  %v1068_v57 = vld [vmem:[#allocation2 + $0x160] sm:$0xff]   ;;  %v42_v59 = vld [vmem:[%s1238_s0 + $0x8] sm:$0x3f]  ;;  %v1072_v5 = vld [vmem:[#allocation2 + $0x170] sm:$0xff]  }
  0x21   :  { %916 = vmatprep.subr.bf16.mxu0 %v1043_v16  ;;  %v1076_v58 = vld [vmem:[#allocation2 + $0x180] sm:$0xff]   ;;  %v62_v61 = vcombine.high %v42_v59, %v42_v59  ;;  %v69_v62 = vrot.slane %v42_v59, %v51_v34  ;;  %v1070_v63 = vld [vmem:[#allocation2 + $0x168] sm:$0xff]   ;;  %v1073_v6 = vld [vmem:[#allocation2 + $0x130] sm:$0xff]  }
  0x22   :  { %937 = vmatpush3.bf16.msra.mxu1 %v1042_v15  ;;  %527 = vmatprep.mubr.bf16.mxu0 %v86_v46  ;;  %v88_v51 = vpack.c.bf16 %v61_v47, %v61_v47  ;;  %v1069_v60 = vld [vmem:[#allocation2 + $0x120] sm:$0xff]   ;;  %v1071_v4 = vld [vmem:[#allocation2 + $0x128] sm:$0xff]   ;;  %v1074_v7 = vld [vmem:[#allocation2 + $0x178] sm:$0xff]  }
  0x23   :  { %938 = vmatprep.subr.bf16.mxu1 %v1045_v18  ;;  %v76_v0 = vrot.slane %v62_v61, %v51_v34  ;;  %v77_v1 = vcombine.high %v69_v62, %v69_v62  ;;  %v1075_v8 = vld [vmem:[#allocation2 + $0x138] sm:$0xff]   ;;  %v89_v9 = vpack.c.bf16 %v69_v62, %v69_v62  ;;  %v1078_v10 = vld [vmem:[%s1241_s3] sm:$0xff]   ;;  %v1079_v11 = vld [vmem:[%s1241_s3 + $0x8] sm:$0xff]  }
  0x24   :  { %917 = vmatpush3.bf16.msra.mxu0 %v1044_v17  ;;  %567 = vmatprep.mubr.bf16.mxu1 %v88_v51  ;;  %v1080_v12 = vld [vmem:[%s1241_s3 + $0x10] sm:$0xff]   ;;  %v1081_v13 = vld [vmem:[%s1241_s3 + $0x18] sm:$0xff]   ;;  %v1082_v14 = vld [vmem:[%s1241_s3 + $0x20] sm:$0xff]  }
  0x25   :  { %918 = vmatprep.subr.bf16.mxu0 %v1047_v20  ;;  %v90_v2 = vpack.c.bf16 %v77_v1, %v77_v1  ;;  %v91_v3 = vpack.c.bf16 %v76_v0, %v76_v0  ;;  %v1083_v15 = vld [vmem:[%s1241_s3 + $0x28] sm:$0xff]   ;;  %v1084_v16 = vld [vmem:[%s1241_s3 + $0x30] sm:$0xff]   ;;  %v1085_v17 = vld [vmem:[%s1241_s3 + $0x38] sm:$0xff]  }
  0x26   :  { %939 = vmatpush3.bf16.msra.mxu1 %v1046_v19  ;;  %v846_v19 = vld [vmem:[%s1240_s2] ss:$0 sm:$0xff]  ;;  %v773_v46 = vld [vmem:[%s1244_s6 + $0x8] sm:$0x3] }
  0x27   :  { %940 = vmatprep.subr.bf16.mxu1 %v1049_v25  ;;  %v897_v47 = vld [vmem:[%s1242_s4] ss:$0 sm:$0xff] }
  0x28   :  { %919 = vmatpush3.bf16.msra.mxu0 %v1048_v24 }
  0x29   :  { %920 = vmatprep.subr.bf16.mxu0 %v1051_v27 }
  0x2a   :  { %941 = vmatpush3.bf16.msra.mxu1 %v1050_v26 }
  0x2b   :  { %942 = vmatprep.subr.bf16.mxu1 %v1053_v31 }
  0x2c   :  { %921 = vmatpush3.bf16.msra.mxu0 %v1052_v30 }
  0x2d   :  { %922 = vmatprep.subr.bf16.mxu0 %v1055_v33 }
  0x2e   :  { %943 = vmatpush3.bf16.msra.mxu1 %v1054_v32 }
  0x2f   :  { %944 = vmatprep.subr.bf16.mxu1 %v1057_v36 }
  0x30   :  { %923 = vmatpush3.bf16.msra.mxu0 %v1056_v35 }
  0x31   :  { %952 = vmatprep.subr.bf16.mxu0 %v1059_v41 }
  0x32   :  { %945 = vmatpush3.bf16.msra.mxu1 %v1058_v39 }
  0x33   :  { %987 = vmatprep.subr.bf16.mxu1 %v1115_v45  ;;  %528 = vmatmul.mubr.bf16.vlgmr.msra.gmra.mrb[0].mxu0 %v85_v44  ;;  %v772_v44 = vld [vmem:[%s1244_s6] sm:$0xff] }
  0x34   :  { %953 = vmatpush3.bf16.msra.mxu0 %v1061_v48  ;;  %607 = vmatprep.mubr.bf16.mxu0 %v90_v2 }
  0x35   :  { %568 = vmatmul.mubr.bf16.vlgmr.msra.gmra.mrb[0].mxu1 %v87_v49  ;;  %954 = vmatprep.subr.bf16.mxu0 %v1062_v50 }
  0x36   :  { %989 = vmatprep.mubr.msk.bf16.mxu1 %vm1116_vm0, %v1115_v45  ;;  %988 = vmatpush3.bf16.msra.mxu1 %v1076_v58 }
  0x37   :  { %993 = vmatprep.subr.bf16.mxu1 %v1115_v45 }
  0x38   :  { %955 = vmatpush3.bf16.msra.mxu0 %v1063_v52 }
  0x39   :  { %956 = vmatprep.subr.bf16.mxu0 %v1064_v53 }
  0x3c   :  { %957 = vmatpush3.bf16.msra.mxu0 %v1065_v54 }
  0x3d   :  { %958 = vmatprep.subr.bf16.mxu0 %v1066_v55  ;;  %990 = vmatmul.mubr.msk.bf16.vlgmr.msra.gmra.mrb[4].mxu1 %vm491_vm1, %v91_v3 }
  0x3e   :  { %1009 = vmatprep.mubr.msk.bf16.mxu1 %vm1116_vm0, %v1115_v45  ;;  %994 = vmatpush3.bf16.msra.mxu1 %v1078_v10 }
  0x3f   :  { %995 = vmatprep.subr.bf16.mxu1 %v1115_v45 }
  0x40   :  { %959 = vmatpush3.bf16.msra.mxu0 %v1067_v56  ;;  %v1086_v56 = vld [vmem:[%s1243_s5] sm:$0x1f]  }
  0x41   :  { %960 = vmatprep.subr.bf16.mxu0 %v1068_v57 }
  0x42   :  { %996 = vmatpush3.bf16.msra.mxu1 %v1079_v11 }
  0x43   :  { %997 = vmatprep.subr.bf16.mxu1 %v1115_v45 }
  0x44   :  { %961 = vmatpush3.bf16.msra.mxu0 %v1069_v60 }
  0x45   :  { %962 = vmatprep.subr.bf16.mxu0 %v1070_v63 }
  0x46   :  { %998 = vmatpush3.bf16.msra.mxu1 %v1080_v12 }
  0x47   :  { %999 = vmatprep.subr.bf16.mxu1 %v1115_v45 }
  0x48   :  { %963 = vmatpush3.bf16.msra.mxu0 %v1071_v4 }
  0x49   :  { %964 = vmatprep.subr.bf16.mxu0 %v1072_v5 }
  0x4a   :  { %1000 = vmatpush3.bf16.msra.mxu1 %v1081_v13 }
  0x4b   :  { %1001 = vmatprep.subr.bf16.mxu1 %v1115_v45 }
  0x4c   :  { %965 = vmatpush3.bf16.msra.mxu0 %v1073_v6 }
  0x4d   :  { %966 = vmatprep.subr.bf16.mxu0 %v1074_v7 }
  0x4e   :  { %1002 = vmatpush3.bf16.msra.mxu1 %v1082_v14 }
  0x4f   :  { %1003 = vmatprep.subr.bf16.mxu1 %v1115_v45 }
  0x50   :  { %967 = vmatpush3.bf16.msra.mxu0 %v1075_v8 }
  0x51   :  { %1013 = vmatprep.subr.bf16.mxu0 %v1115_v45 }
  0x52   :  { %1004 = vmatpush3.bf16.msra.mxu1 %v1083_v15 }
  0x53   :  { %608 = vmatmul.mubr.bf16.vlgmr.msra.gmra.mrb[4].mxu0 %v89_v9  ;;  %1005 = vmatprep.subr.bf16.mxu1 %v1115_v45 }
  0x54   :  { %1015 = vmatprep.mubr.msk.bf16.mxu0 %vm1116_vm0, %v1115_v45 }
  0x56   :  { %1006 = vmatpush3.bf16.msra.mxu1 %v1084_v16 }
  0x57   :  { %1007 = vmatprep.subr.bf16.mxu1 %v1115_v45  ;;  %v1117_v45 = vmov 0  }
  0x58   :  { %1026 = vset.pattern.permute.xlu0 %v1117_v45 }
  0x59   :  { %776 = vperm.xlu0 %1026, %v772_v44  }
  0x5a   :  { %1008 = vmatpush3.bf16.msra.mxu1 %v1085_v17 }
  0x5d   :  { %781 = vperm.xlu0 %1026, %v773_v46  }
  0xd8   :  { %v777_v57 = vpop.permute.xlu0 %776 }
  0xdc   :  { %v782_v61 = vpop.permute.xlu0 %781 }
 0x106   :  { %v924_v18 = vpop.f32.mrb[0].mxu0 }
 0x107   :  { %v925_v20 = vpop.f32.mrb[1].mxu0 }
 0x108   :  { %v926_v21 = vadd.f32 %v925_v20, %v924_v18  ;;  %v927_v22 = vpop.f32.mrb[2].mxu0  ;;  %v946_v23 = vpop.f32.mrb[0].mxu1 }
 0x109   :  { %v928_v24 = vpop.f32.mrb[3].mxu0  ;;  %v947_v25 = vpop.f32.mrb[1].mxu1 }
 0x10a   :  { %v530_v26 = vadd.f32 %v926_v21, %v846_v19  ;;  %v948_v27 = vadd.f32 %v947_v25, %v946_v23  ;;  %v949_v28 = vpop.f32.mrb[2].mxu1 }
 0x10b   :  { %v950_v29 = vpop.f32.mrb[3].mxu1 }
 0x10c   :  { %v570_v30 = vadd.f32 %v948_v27, %v530_v26 }
 0x110   :  { %v649_v31 = vpop.f32.mrb[4].mxu1 }
 0x111   :  { %v991_v32 = vpop.f32.mrb[5].mxu1 }
 0x112   :  { %v652_v33 = vpop.f32.mrb[6].mxu1 }
 0x113   :  { %v992_v34 = vpop.f32.mrb[7].mxu1 }
 0x126   :  { %v968_v35 = vpop.f32.mrb[4].mxu0 }
 0x127   :  { %v969_v36 = vpop.f32.mrb[5].mxu0 }
 0x128   :  { %v970_v37 = vadd.f32 %v969_v36, %v968_v35  ;;  %v971_v38 = vpop.f32.mrb[6].mxu0 }
 0x129   :  { %v972_v39 = vpop.f32.mrb[7].mxu0 }
 0x12a   :  { %v610_v40 = vadd.f32 %v970_v37, %v570_v30 }
 0x12c   :  { %v650_v41 = vadd.f32 %v649_v31, %v610_v40 }
 0x12e   :  { %v655_v42 = vmax.f32 %v650_v41, 0.0 }
 0x130   :  { %v656_v43 = vpack.c.bf16 %v655_v42, %v655_v42 }
 0x132   :  { %1010 = vmatmul.mubr.bf16.vlgmr.msra.gmra.mrb[8].mxu1 %v656_v43 }
 0x205   :  { %v762_v48 = vpop.f32.mrb[8].mxu1 }
 0x206   :  { %v763_v49 = vadd.f32 %v897_v47, %v762_v48  ;;  %v1011_v50 = vpop.f32.mrb[9].mxu1 }
 0x207   :  { %v765_v51 = vpop.f32.mrb[10].mxu1 }
 0x208   :  { %v768_v52 = vmax.f32 %v763_v49, 0.0  ;;  %v1012_v53 = vpop.f32.mrb[11].mxu1 }
 0x20a   :  { %v771_v54 = vpack.c.bf16 %v768_v52, %v768_v52 }
 0x20c   :  { %v794_v55 = vsel %vm789_vm2, %v771_v54, 0 }
 0x20d   :  { %1014 = vmatpush3.bf16.xpose.msra.mxu0 %v794_v55 }
 0x214   :  { %1016 = vmatmul.mubr.msk.bf16.vlgmr.msra.gmra.mrb[8].mxu0 %vm789_vm2, %v1086_v56 }
 0x2e7   :  { %v830_v58 = vpop.f32.mrb[8].mxu0 }
 0x2e8   :  { %v831_v59 = vadd.f32 %v830_v58, %v777_v57  ;;  %v1017_v60 = vpop.f32.mrb[9].mxu0 }
 0x2e9   :  { %v833_v62 = vpop.f32.mrb[10].mxu0 }
 0x2ea   :  { %838 = vst.msk [vmem:[%s1245_s7] sm:$0xff] %vm837_vm3, %v831_v59  ;;  %v834_v63 = vadd.f32 %v833_v62, %v782_v61  ;;  %v1018_v0 = vpop.f32.mrb[11].mxu0 }
 0x2ec   :  { %840 = vst.msk [vmem:[%s1245_s7 + $0x8] sm:$0x3] %vm839_vm4, %v834_v63 }
 0x2ed   :  { %845 = vsyncpa [#allocation3], 1 }

</bundles_post_ra>
